<compile_context>
chip_gen: v7x
topology: tpu7x:2x2x1
jax: 0.10.0
libtpu: 0.0.40
codegen_flags: <defaults>
</compile_context>

<pallas_src>
import functools

import jax
import jax.numpy as jnp
from jax import lax
from jax.experimental import pallas as pl
from jax.experimental.pallas import tpu as pltpu

BN_EPS = 1e-5


def nl_block_kernel(x_ref, wqkv_ref, bqkv_ref, wz_ref, bz_ref, o_ref, *,
                    bb, t, ci):
    """One grid step = one batch-block of `bb` sequences of length `t`.

    x_ref:    (bb*t, C)   input, channels-last, batch folded into rows
    wqkv_ref: (C, 3*ci)   [w_theta | w_phi | w_g], pre-transposed
    bqkv_ref: (1, 3*ci)
    wz_ref:   (ci, C)     W_z conv weight, pre-transposed, eval-BN folded in
    bz_ref:   (1, C)      W_z bias with eval-BN folded in
    o_ref:    (bb*t, C)
    """
    x = x_ref[...]                                            # activation dtype

    # Fused theta/phi/g projection: single MXU pass, K = C, N = 3*ci.
    qkv = jnp.dot(x, wqkv_ref[...],
                  preferred_element_type=jnp.float32) + bqkv_ref[...]
    theta = qkv[:, :ci].reshape(bb, t, ci)
    phi = qkv[:, ci:2 * ci].reshape(bb, t, ci)
    g = qkv[:, 2 * ci:].reshape(bb, t, ci)

    # f[b] = theta[b] @ phi[b]^T : contract the channel axis directly
    # (no materialized transpose of phi through the XLU).
    f = lax.dot_general(theta, phi,
                        dimension_numbers=(((2,), (2,)), ((0,), (0,))),
                        preferred_element_type=jnp.float32)   # (bb, t, t)

    # Softmax over the last axis (embedded-Gaussian mode), stats in f32.
    f = f - jnp.max(f, axis=-1, keepdims=True)
    p = jnp.exp(f)
    attn = p * pl.reciprocal(jnp.sum(p, axis=-1, keepdims=True), approx=True)

    # y[b] = attn[b] @ g[b]  -> (bb, t, ci)
    y = lax.dot_general(attn, g,
                        dimension_numbers=(((2,), (1,)), ((0,), (0,))),
                        preferred_element_type=jnp.float32)
    y2d = y.reshape(bb * t, ci)

    # W_z 1x1 conv with eval-mode BatchNorm pre-folded, then residual add.
    wy = jnp.dot(y2d, wz_ref[...],
                 preferred_element_type=jnp.float32) + bz_ref[...]
    o_ref[...] = (wy + x.astype(jnp.float32)).astype(o_ref.dtype)


def _pick_batch_block(n, t, c, ci, budget_bytes=20 * 1024 * 1024):
    """Largest batch block whose f32 working set fits a conservative budget."""
    per_elem = 4 * (3 * t * t + 2 * t * c + 6 * t * ci)   # (T,T) scores dominate
    bb = max(1, min(n, budget_bytes // max(per_elem, 1)))
    while n % bb:                 # block must tile the batch evenly
        bb -= 1
    if (bb * t) % 8 and bb != n:
        # Respect the (8, 128) sublane constraint on the row block; a block
        # equal to the full array dim is always allowed.
        # TODO(synk): pad T instead when N*T is large and T % 8 != 0.
        bb = n
    return bb


def nl_block(x_nct, params):
    """x_nct: (N, C, T) like the PyTorch Conv1d input. Returns (N, C, T, 1)."""
    n, c, t = x_nct.shape
    ci = params["w_theta"].shape[0]
    dtype = x_nct.dtype

    # ---- wrapper-side parameter prep (done once, outside the kernel) -------
    # Fuse theta/phi/g into one pre-transposed (C, 3*Ci) weight + (1, 3*Ci) bias.
    wqkv = jnp.concatenate(
        [params["w_theta"], params["w_phi"], params["w_g"]], axis=0).T
    bqkv = jnp.concatenate(
        [params["b_theta"], params["b_phi"], params["b_g"]]).reshape(1, -1)
    # Fold eval-mode BatchNorm into the W_z conv (numerically equivalent in f32).
    s = params["bn_gamma"] * lax.rsqrt(params["bn_var"] + BN_EPS)       # (C,)
    wz = (params["w_z"] * s[:, None]).T                                 # (Ci, C)
    bz = (s * (params["b_z"] - params["bn_mean"])
          + params["bn_beta"]).reshape(1, -1)                           # (1, C)
    # Keep MXU operands in the activation dtype (bf16 activations -> bf16 MXU).
    wqkv = wqkv.astype(dtype)
    wz = wz.astype(dtype)

    # Channels-last with batch folded into rows -> sublane-dense (N*T, C) slab.
    x2d = jnp.transpose(x_nct, (0, 2, 1)).reshape(n * t, c)

    bb = _pick_batch_block(n, t, c, ci)
    rows = bb * t
    grid = (n // bb,)

    kernel = functools.partial(nl_block_kernel, bb=bb, t=t, ci=ci)
    const = lambda shape: pl.BlockSpec(shape, lambda i: (0, 0))

    out2d = pl.pallas_call(
        kernel,
        out_shape=jax.ShapeDtypeStruct((n * t, c), dtype),
        grid_spec=pltpu.PrefetchScalarGridSpec(
            num_scalar_prefetch=0,
            grid=grid,
            in_specs=[
                pl.BlockSpec((rows, c), lambda i: (i, 0)),   # x, per batch-block
                const((c, 3 * ci)),                          # fused qkv weight
                const((1, 3 * ci)),                          # fused qkv bias
                const((ci, c)),                              # W_z (BN folded)
                const((1, c)),                               # b_z (BN folded)
            ],
            out_specs=pl.BlockSpec((rows, c), lambda i: (i, 0))),
        compiler_params=pltpu.CompilerParams(
            dimension_semantics=("parallel",),
            vmem_limit_bytes=48 * 1024 * 1024),
    )(x2d, wqkv, bqkv, wz, bz)

    z = jnp.transpose(out2d.reshape(n, t, c), (0, 2, 1))     # (N, C, T)
    return z[..., None]                                      # unsqueeze(3)


def nl_block_ref(x_nct, p):
    """Pure-JAX reference mirroring the PyTorch forward (dimension=1, embedded)."""
    def conv1x1(x, w, b):                               # x: (N, Cin, T), w: (Cout, Cin)
        return jnp.einsum('oc,nct->not', w, x) + b[None, :, None]

    g_x = conv1x1(x_nct, p["w_g"], p["b_g"]).transpose(0, 2, 1)          # (N, T, Ci)
    theta_x = conv1x1(x_nct, p["w_theta"], p["b_theta"]).transpose(0, 2, 1)
    phi_x = conv1x1(x_nct, p["w_phi"], p["b_phi"])                        # (N, Ci, T)
    f = jnp.einsum('ntc,nck->ntk', theta_x, phi_x)
    f_div_C = jax.nn.softmax(f, axis=-1)
    y = jnp.einsum('ntk,nkc->ntc', f_div_C, g_x).transpose(0, 2, 1)       # (N, Ci, T)
    wy = conv1x1(y, p["w_z"], p["b_z"])
    gamma = p["bn_gamma"][None, :, None]
    beta = p["bn_beta"][None, :, None]
    mean = p["bn_mean"][None, :, None]
    var = p["bn_var"][None, :, None]
    wy = gamma * (wy - mean) * jax.lax.rsqrt(var + BN_EPS) + beta
    z = wy + x_nct
    return z[..., None]


if __name__ == "__main__":
    # Small shapes: batch=2, in_channels=32, T=16, inter_channels = 32 // 2 = 16.
    N, C, T = 2, 32, 16
    Ci = C // 2

    key = jax.random.PRNGKey(0)
    ks = jax.random.split(key, 12)
    scale = 0.1
    params = {
        # 1x1 conv weights stored as (Cout, Cin); bias as (Cout,)
        "w_theta": scale * jax.random.normal(ks[0], (Ci, C), jnp.float32),
        "b_theta": scale * jax.random.normal(ks[1], (Ci,), jnp.float32),
        "w_phi":   scale * jax.random.normal(ks[2], (Ci, C), jnp.float32),
        "b_phi":   scale * jax.random.normal(ks[3], (Ci,), jnp.float32),
        "w_g":     scale * jax.random.normal(ks[4], (Ci, C), jnp.float32),
        "b_g":     scale * jax.random.normal(ks[5], (Ci,), jnp.float32),
        "w_z":     scale * jax.random.normal(ks[6], (C, Ci), jnp.float32),
        "b_z":     scale * jax.random.normal(ks[7], (C,), jnp.float32),
        # BatchNorm (eval mode).  NOTE: the PyTorch module inits gamma=beta=0
        # (identity residual); we use deterministic non-zero values here so the
        # non-local branch actually contributes and the kernel is exercised.
        "bn_gamma": 0.5 + 0.05 * jnp.arange(C, dtype=jnp.float32),
        "bn_beta":  0.01 * jnp.arange(C, dtype=jnp.float32),
        "bn_mean":  jnp.zeros((C,), jnp.float32),
        "bn_var":   jnp.ones((C,), jnp.float32),
    }

    x = jax.random.normal(ks[8], (N, C, T), jnp.float32)   # PyTorch (N, C, T) layout

    z = jax.block_until_ready(nl_block(x, params))
    z_ref = jax.block_until_ready(nl_block_ref(x, params))

    assert z.shape == (N, C, T, 1), z.shape
    # Tolerance covers the EUP approximate reciprocal in the softmax
    # normalization (everything else is exact f32 up to rounding order).
    assert jnp.allclose(z, z_ref, rtol=2e-3, atol=2e-3), (
        float(jnp.max(jnp.abs(z - z_ref))))
    print("KERNEL_OK")
</pallas_src>

<mosaic_0001>
module attributes {stable_mosaic.version = 11 : i64} {
  func.func @nl_block_kernel(%arg0: i32, %arg1: memref<32x32xf32, #tpu.memory_space<vmem>>, %arg2: memref<32x48xf32, #tpu.memory_space<vmem>>, %arg3: memref<1x48xf32, #tpu.memory_space<vmem>>, %arg4: memref<16x32xf32, #tpu.memory_space<vmem>>, %arg5: memref<1x32xf32, #tpu.memory_space<vmem>>, %arg6: memref<32x32xf32, #tpu.memory_space<vmem>>) attributes {dimension_semantics = [#tpu.dimension_semantics<parallel>], iteration_bounds = array<i64: 1>, scalar_prefetch = 0 : i64, scratch_operands = 0 : i64, tpu.core_type = #tpu.core_type<tc>, window_params = [{transform_indices = @transform_0, window_bounds = array<i64: 32, 32>}, {pipeline_mode = #tpu.pipeline_mode<synchronous>, transform_indices = @transform_1, window_bounds = array<i64: 32, 48>}, {pipeline_mode = #tpu.pipeline_mode<synchronous>, transform_indices = @transform_2, window_bounds = array<i64: 1, 48>}, {pipeline_mode = #tpu.pipeline_mode<synchronous>, transform_indices = @transform_3, window_bounds = array<i64: 16, 32>}, {pipeline_mode = #tpu.pipeline_mode<synchronous>, transform_indices = @transform_4, window_bounds = array<i64: 1, 32>}, {transform_indices = @transform_5, window_bounds = array<i64: 32, 32>}]} {
    %c0 = arith.constant 0 : index
    %c0_0 = arith.constant 0 : index
    %0 = vector.load %arg1[%c0, %c0_0] : memref<32x32xf32, #tpu.memory_space<vmem>>, vector<32x32xf32>
    %c0_1 = arith.constant 0 : index
    %c0_2 = arith.constant 0 : index
    %1 = vector.load %arg2[%c0_1, %c0_2] : memref<32x48xf32, #tpu.memory_space<vmem>>, vector<32x48xf32>
    %cst = arith.constant dense<0.000000e+00> : vector<32x48xf32>
    %2 = tpu.matmul %0, %1, %cst {dimension_numbers = #tpu.dot_dimension_numbers<[1], [0], [0], [1], [0, 0, 1, 1], [], []>} : vector<32x32xf32>, vector<32x48xf32>, vector<32x48xf32> -> vector<32x48xf32>
    %c0_3 = arith.constant 0 : index
    %c0_4 = arith.constant 0 : index
    %3 = vector.load %arg3[%c0_3, %c0_4] : memref<1x48xf32, #tpu.memory_space<vmem>>, vector<1x48xf32>
    %4 = vector.broadcast %3 : vector<1x48xf32> to vector<32x48xf32>
    %5 = arith.addf %2, %4 : vector<32x48xf32>
    %6 = vector.extract_strided_slice %5 {offsets = [0, 0], sizes = [32, 16], strides = [1, 1]} : vector<32x48xf32> to vector<32x16xf32>
    %7 = vector.shape_cast %6 : vector<32x16xf32> to vector<2x16x16xf32>
    %8 = vector.extract_strided_slice %5 {offsets = [0, 16], sizes = [32, 16], strides = [1, 1]} : vector<32x48xf32> to vector<32x16xf32>
    %9 = vector.shape_cast %8 : vector<32x16xf32> to vector<2x16x16xf32>
    %10 = vector.extract_strided_slice %5 {offsets = [0, 32], sizes = [32, 16], strides = [1, 1]} : vector<32x48xf32> to vector<32x16xf32>
    %11 = vector.shape_cast %10 : vector<32x16xf32> to vector<2x16x16xf32>
    %cst_5 = arith.constant dense<0.000000e+00> : vector<2x16x16xf32>
    %12 = tpu.matmul %7, %9, %cst_5 {dimension_numbers = #tpu.dot_dimension_numbers<[2], [2], [1], [1], [0, 0, 0, 1, 1, 1], [0], [0]>} : vector<2x16x16xf32>, vector<2x16x16xf32>, vector<2x16x16xf32> -> vector<2x16x16xf32>
    %cst_6 = arith.constant dense<0xFF800000> : vector<2x16xf32>
    %13 = vector.multi_reduction <maximumf>, %12, %cst_6 [2] : vector<2x16x16xf32> to vector<2x16xf32>
    %14 = vector.shape_cast %13 : vector<2x16xf32> to vector<2x16x1xf32>
    %15 = vector.broadcast %14 : vector<2x16x1xf32> to vector<2x16x16xf32>
    %16 = arith.subf %12, %15 : vector<2x16x16xf32>
    %17 = math.exp %16 : vector<2x16x16xf32>
    %cst_7 = arith.constant dense<0.000000e+00> : vector<2x16xf32>
    %18 = vector.multi_reduction <add>, %17, %cst_7 [2] : vector<2x16x16xf32> to vector<2x16xf32>
    %19 = vector.shape_cast %18 : vector<2x16xf32> to vector<2x16x1xf32>
    %20 = tpu.reciprocal %19 {approx = true} : vector<2x16x1xf32> -> vector<2x16x1xf32>
    %21 = vector.broadcast %20 : vector<2x16x1xf32> to vector<2x16x16xf32>
    %22 = arith.mulf %17, %21 : vector<2x16x16xf32>
    %cst_8 = arith.constant dense<0.000000e+00> : vector<2x16x16xf32>
    %23 = tpu.matmul %22, %11, %cst_8 {dimension_numbers = #tpu.dot_dimension_numbers<[2], [1], [1], [2], [0, 0, 0, 1, 1, 2], [0], [0]>} : vector<2x16x16xf32>, vector<2x16x16xf32>, vector<2x16x16xf32> -> vector<2x16x16xf32>
    %24 = vector.shape_cast %23 : vector<2x16x16xf32> to vector<32x16xf32>
    %c0_9 = arith.constant 0 : index
    %c0_10 = arith.constant 0 : index
    %25 = vector.load %arg4[%c0_9, %c0_10] : memref<16x32xf32, #tpu.memory_space<vmem>>, vector<16x32xf32>
    %cst_11 = arith.constant dense<0.000000e+00> : vector<32x32xf32>
    %26 = tpu.matmul %24, %25, %cst_11 {dimension_numbers = #tpu.dot_dimension_numbers<[1], [0], [0], [1], [0, 0, 1, 1], [], []>} : vector<32x16xf32>, vector<16x32xf32>, vector<32x32xf32> -> vector<32x32xf32>
    %c0_12 = arith.constant 0 : index
    %c0_13 = arith.constant 0 : index
    %27 = vector.load %arg5[%c0_12, %c0_13] : memref<1x32xf32, #tpu.memory_space<vmem>>, vector<1x32xf32>
    %28 = vector.broadcast %27 : vector<1x32xf32> to vector<32x32xf32>
    %29 = arith.addf %26, %28 : vector<32x32xf32>
    %30 = arith.addf %29, %0 : vector<32x32xf32>
    %c0_14 = arith.constant 0 : index
    %c0_15 = arith.constant 0 : index
    %31 = vector.load %arg6[%c0_14, %c0_15] : memref<32x32xf32, #tpu.memory_space<vmem>>, vector<32x32xf32>
    tpu.vector_store %arg6[%c0_14, %c0_15], %30 {strides = array<i32>} : memref<32x32xf32, #tpu.memory_space<vmem>>, vector<32x32xf32>,
    return
  }
  func.func @transform_0(%arg0: i32) -> (i32, i32) {
    %c0_i32 = arith.constant 0 : i32
    %c0_i32_0 = arith.constant 0 : i32
    return %arg0, %c0_i32 : i32, i32
  }
  func.func @transform_1(%arg0: i32) -> (i32, i32) {
    %c0_i32 = arith.constant 0 : i32
    %c0_i32_0 = arith.constant 0 : i32
    %c0_i32_1 = arith.constant 0 : i32
    return %c0_i32, %c0_i32_0 : i32, i32
  }
  func.func @transform_2(%arg0: i32) -> (i32, i32) {
    %c0_i32 = arith.constant 0 : i32
    %c0_i32_0 = arith.constant 0 : i32
    %c0_i32_1 = arith.constant 0 : i32
    return %c0_i32, %c0_i32_0 : i32, i32
  }
  func.func @transform_3(%arg0: i32) -> (i32, i32) {
    %c0_i32 = arith.constant 0 : i32
    %c0_i32_0 = arith.constant 0 : i32
    %c0_i32_1 = arith.constant 0 : i32
    return %c0_i32, %c0_i32_0 : i32, i32
  }
  func.func @transform_4(%arg0: i32) -> (i32, i32) {
    %c0_i32 = arith.constant 0 : i32
    %c0_i32_0 = arith.constant 0 : i32
    %c0_i32_1 = arith.constant 0 : i32
    return %c0_i32, %c0_i32_0 : i32, i32
  }
  func.func @transform_5(%arg0: i32) -> (i32, i32) {
    %c0_i32 = arith.constant 0 : i32
    %c0_i32_0 = arith.constant 0 : i32
    return %arg0, %c0_i32 : i32, i32
  }
}

</mosaic_0001>

<bundles_post_ra>
// kernel: tpu_custom_call.1
= control target key start
LH: loop header
LB: loop body
LE: loop exit
PB: predicated region body
PF: predicated region fallthrough
CT: control target
= control target key end

     0   :  { %10 = vsyncpa [#allocation3], 0  ;;  %s1141_s0 = inlined_call_operand.hbm [shape: f32[32,32], index: 0, kind: input, shape index: {}]   ;;  %s1142_s1 = inlined_call_operand.hbm [shape: f32[32,48], index: 1, kind: input, shape index: {}]   ;;  %s1143_s2 = inlined_call_operand.vmem [shape: f32[1,48], index: 2, kind: input, shape index: {}]   ;;  %s1144_s3 = inlined_call_operand.hbm [shape: f32[16,32], index: 3, kind: input, shape index: {}]   ;;  %s1145_s4 = inlined_call_operand.vmem [shape: f32[1,32], index: 4, kind: input, shape index: {}]   ;;  %s1146_s5 = inlined_call_operand.hbm [shape: f32[32,32], index: 5, kind: output, shape index: {}]  }
   0x1   :  { %11 = vsyncpa [#allocation6], 0 }
   0x2   :  { %12 = vsyncpa [#allocation4], 0  ;;  %s980_s18 = smov [#allocation5]   ;;  %s981_s20 = smov [#allocation2]  }
   0x3   :  { %s30_s19 = sshll.u32 %s980_s18, 4  ;;  %s18_s21 = sshll.u32 %s981_s20, 4  ;;  %s31_s19 = int_to_ptr.vmem [resolvable:$true] %s30_s19  ;;  %s1018_s21 = int_to_ptr.vmem [resolvable:$true] %s18_s21 }
   0x4   :  { %s886_s24 = scalar_lea.hbm %s1142_s1, 512 }
   0x5   :  { %p887_p0 = scmp.ne.s32.totalorder %s1142_s1, %s886_s24  ;;  %p890_p1 = scmp.lt.u32.totalorder %s886_s24, %s1142_s1 }
   0x7   :  { %p892_p2 = pnand %p890_p1, %p887_p0 }
   0x9   :  { %895 = shalt.err (!%p892_p2)
}
   0xa   :  { %s896_s29 = scalar_lea.vmem %s31_s19, 512  ;;  %p901_p4 = scmp.lt.s32.totalorder %s31_s19, %s31_s19 }
   0xb   :  { %p897_p3 = scmp.ne.s32.totalorder %s31_s19, %s896_s29  ;;  %p902_p5 = scmp.lt.s32.totalorder %s896_s29, %s896_s29 }
   0xd   :  { %p903_p6 = por %p902_p5, %p901_p4 }
   0xf   :  { %p904_p7 = pnand %p903_p6, %p897_p3 }
  0x11   :  { %907 = shalt.err (!%p904_p7)
}
  0x12   :  { %s982_s30 = smov 128   ;;  %s983_s6 = smov 8  }
  0x13   :  { %36 = dma.hbm_to_vmem [thread:$0]  %s1142_s1, 512, %s31_s19, [#allocation6], %s982_s30, %s982_s30, %s983_s6  }
  0x14   :  { %s908_s11 = scalar_lea.hbm %s1141_s0, 512 }
  0x15   :  { %p909_p8 = scmp.ne.s32.totalorder %s1141_s0, %s908_s11  ;;  %p912_p9 = scmp.lt.u32.totalorder %s908_s11, %s1141_s0 }
  0x17   :  { %p914_p10 = pnand %p912_p9, %p909_p8 }
  0x19   :  { %917 = shalt.err (!%p914_p10)
}
  0x1a   :  { %s918_s16 = scalar_lea.vmem %s1018_s21, 512  ;;  %p923_p12 = scmp.lt.s32.totalorder %s1018_s21, %s1018_s21 }
  0x1b   :  { %p919_p11 = scmp.ne.s32.totalorder %s1018_s21, %s918_s16  ;;  %p924_p13 = scmp.lt.s32.totalorder %s918_s16, %s918_s16 }
  0x1d   :  { %p925_p0 = por %p924_p13, %p923_p12 }
  0x1f   :  { %p926_p1 = pnand %p925_p0, %p919_p11 }
  0x21   :  { %929 = shalt.err (!%p926_p1)
}
  0x22   :  { %24 = dma.hbm_to_vmem [thread:$0]  %s1141_s0, 512, %s1018_s21, [#allocation3], %s982_s30, %s982_s30, %s983_s6  }
  0x23   :  { %s984_s18 = smov [#allocation7]   ;;  %s930_s23 = scalar_lea.hbm %s1144_s3, 256 }
  0x24   :  { %s44_s19 = sshll.u32 %s984_s18, 4  ;;  %p931_p2 = scmp.ne.s32.totalorder %s1144_s3, %s930_s23  ;;  %s45_s19 = int_to_ptr.vmem [resolvable:$true] %s44_s19 }
  0x25   :  { %p934_p3 = scmp.lt.u32.totalorder %s930_s23, %s1144_s3 }
  0x27   :  { %p936_p4 = pnand %p934_p3, %p931_p2 }
  0x29   :  { %939 = shalt.err (!%p936_p4)
}
  0x2a   :  { %s940_s28 = scalar_lea.vmem %s45_s19, 256  ;;  %p945_p6 = scmp.lt.s32.totalorder %s45_s19, %s45_s19 }
  0x2b   :  { %p941_p5 = scmp.ne.s32.totalorder %s45_s19, %s940_s28  ;;  %p946_p7 = scmp.lt.s32.totalorder %s940_s28, %s940_s28 }
  0x2d   :  { %p947_p8 = por %p946_p7, %p945_p6 }
  0x2f   :  { %p948_p9 = pnand %p947_p8, %p941_p5 }
  0x31   :  { %951 = shalt.err (!%p948_p9)
}
  0x32   :  { %50 = dma.hbm_to_vmem [thread:$0]  %s1144_s3, 256, %s45_s19, [#allocation6], %s982_s30, %s982_s30, %s983_s6  }
  0x33   :  { %974 = dma.done.wait [#allocation3], 512  }
  0x34   :  { %975 = vsyncadd [#allocation3], 4294966784 }
  0x35   :  { %976 = dma.done.wait [#allocation6], 768  }
  0x36   :  { %977 = vsyncadd [#allocation6], 4294966528  ;;  %vm77_vm0 = vcmask 261120   ;;  %v66_v0 = vld [vmem:[#allocation5] sm:$0xff]  ;;  %v67_v1 = vld [vmem:[#allocation5 + $0x8] sm:$0xff]  ;;  %vm181_vm1 = vcmask 130048  }
  0x37   :  { %v68_v2 = vld [vmem:[#allocation5 + $0x10] sm:$0xff]  ;;  %v808_v3 = vpack.c.bf16 %v67_v1, %v66_v0  ;;  %v69_v4 = vld [vmem:[#allocation5 + $0x18] sm:$0xff]  ;;  %v1070_v5 = vld [vmem:[#allocation2] sm:$0xff]  ;;  %s985_s7 = smov 112   ;;  %s987_s10 = smov [#allocation8]  }
  0x38   :  { %v812_v6 = vpack.c.bf16 %v69_v4, %v68_v2  ;;  %764 = vmatprep.mubr.msk.f32.mxu0 %vm77_vm0, %v1070_v5  ;;  %v1074_v7 = vld [vmem:[#allocation2 + $0x8] sm:$0xff]  ;;  %v1076_v8 = vld [vmem:[#allocation2 + $0x10] sm:$0xff]  ;;  %v1082_v9 = vld [vmem:[#allocation2 + $0x18] sm:$0xff]  ;;  %s691_s11 = sshll.u32 %s987_s10, 4  ;;  %s692_s11 = int_to_ptr.vmem [resolvable:$true] %s691_s11 }
  0x39   :  { %809 = vmatprep.subr.bf16.mxu0 %v808_v3  ;;  %v704_v10 = vld [vmem:[%s1143_s2] ss:$0 sm:$0xff]  ;;  %vm817_vm2 = vmpackc.low %vm181_vm1, %vm181_vm1  ;;  %s986_s2 = smov 96   ;;  %v573_v58 = vld [vmem:[#allocation7 + $0x8] sm:$0xff]  ;;  %p957_p11 = scmp.lt.s32.totalorder %s692_s11, %s692_s11 }
  0x3a   :  { %811 = vmatpush3.bf16.msra.mxu0 %v808_v3  ;;  %v572_v57 = vld [vmem:[#allocation7] sm:$0xff] }
  0x3b   :  { %813 = vmatprep.subr.bf16.mxu0 %v812_v6  ;;  %v836_v59 = vpack.c.bf16 %v573_v58, %v572_v57 }
  0x3e   :  { %815 = vmatpush3.bf16.msra.mxu0 %v812_v6 }
  0x41   :  { %765 = vmatmul.mubr.msk.f32.vlgmr.msra.gmra.mrb[0].mxu0 %vm77_vm0, %v1074_v7 }
  0x42   :  { %767 = vmatprep.mubr.msk.f32.mxu0 %vm77_vm0, %v1076_v8 }
  0x45   :  { %768 = vmatmul.mubr.msk.f32.gmra.mrb[2].mxu0 %vm77_vm0, %v1082_v9 }
 0x114   :  { %v766_v11 = vpop.f32.mrb[0].mxu0 }
 0x115   :  { %v162_v12 = vadd.f32 %v766_v11, %v704_v10  ;;  %v156_v13 = vpop.f32.mrb[1].mxu0 }
 0x116   :  { %v157_v14 = vadd.f32 %v704_v10, %v156_v13 }
 0x118   :  { %v769_v15 = vpop.f32.mrb[2].mxu0  ;;  %774 = vmatprep.mubr.msk.f32.mxu1 %vm181_vm1, %v157_v14  ;;  %v1090_v16 = vpack.i.bf16 %v162_v12, %v157_v14 }
 0x119   :  { %v172_v17 = vadd.f32 %v769_v15, %v704_v10  ;;  %v166_v18 = vpop.f32.mrb[3].mxu0 }
 0x11a   :  { %v167_v19 = vadd.f32 %v704_v10, %v166_v18  ;;  %851 = vrot.lane.b32.xlu0 %v1090_v16, %s985_s7 }
 0x11c   :  { %v855_v20 = vpack.i.bf16 %v172_v17, %v167_v19  ;;  %781 = vmatprep.mubr.msk.f32.mxu0 %vm181_vm1, %v167_v19 }
 0x11e   :  { %856 = vrot.lane.b32.xlu0 %v855_v20, %s985_s7 }
 0x18c   :  { %v852_v21 = vpop.permute.xlu0 %851 }
 0x18d   :  { %v854_v22 = vunpack.i.h.bf16 %v852_v21  ;;  %v853_v23 = vunpack.i.l.bf16 %v852_v21 }
 0x18f   :  { %v816_v24 = vpack.c.bf16 %v854_v22, %v853_v23 }
 0x190   :  { %v857_v25 = vpop.permute.xlu0 %856 }
 0x191   :  { %v859_v26 = vunpack.i.h.bf16 %v857_v25  ;;  %v858_v27 = vunpack.i.l.bf16 %v857_v25  ;;  %818 = vmatprep.subr.msk.bf16.mxu1 %vm817_vm2, %v816_v24 }
 0x192   :  { %821 = vmatpush3.bf16.xpose.msk.msra.mxu1 %vm817_vm2, %v816_v24  ;;  %v721_v24 = vld [vmem:[%s1145_s4] ss:$0 sm:$0xff]  ;;  %s952_s4 = scalar_lea.vmem %s692_s11, 512 }
 0x193   :  { %v822_v28 = vpack.c.bf16 %v859_v26, %v858_v27  ;;  %p953_p10 = scmp.ne.s32.totalorder %s692_s11, %s952_s4  ;;  %p958_p12 = scmp.lt.s32.totalorder %s952_s4, %s952_s4 }
 0x195   :  { %824 = vmatprep.subr.msk.bf16.mxu0 %vm817_vm2, %v822_v28  ;;  %p959_p13 = por %p958_p12, %p957_p11 }
 0x196   :  { %827 = vmatpush3.bf16.xpose.msk.msra.mxu0 %vm817_vm2, %v822_v28 }
 0x197   :  { %837 = vmatprep.subr.bf16.mxu0 %v836_v59  ;;  %p960_p0 = pnand %p959_p13, %p953_p10 }
 0x199   :  { %775 = vmatmul.mubr.msk.f32.vlgmr.msra.gmra.mrb[0].mxu1 %vm181_vm1, %v162_v12 }
 0x19d   :  { %782 = vmatmul.mubr.msk.f32.vlgmr.msra.gmra.mrb[4].mxu0 %vm181_vm1, %v172_v17 }
 0x19e   :  { %839 = vmatpush3.bf16.msra.mxu0 %v836_v59 }
 0x26c   :  { %v776_v29 = vpop.f32.mrb[0].mxu1 }
 0x26d   :  { %v256_v30 = vpop.f32.mrb[1].mxu1  ;;  %v357_v35 = vsel %vm181_vm1, %v776_v29, -inf }
 0x26e   :  { %v354_v31 = vsel %vm181_vm1, %v256_v30, -inf }
 0x26f   :  { %355 = vmax.xlane.f32.xlu1 %v354_v31 }
 0x270   :  { %v783_v32 = vpop.f32.mrb[4].mxu0 }
 0x271   :  { %v345_v33 = vpop.f32.mrb[5].mxu0  ;;  %v363_v36 = vsel %vm181_vm1, %v783_v32, -inf }
 0x272   :  { %v360_v34 = vsel %vm181_vm1, %v345_v33, -inf }
 0x273   :  { %361 = vmax.xlane.f32.xlu0 %v360_v34  ;;  %358 = vmax.xlane.f32.xlu1 %v357_v35 }
 0x277   :  { %364 = vmax.xlane.f32.xlu1 %v363_v36 }
 0x289   :  { %866 = vrot.lane.b32.xlu0 %v855_v20, %s986_s2 }
 0x2fc   :  { %v356_v37 = vpop.xlane.xlu1 %355 }
 0x2fd   :  { %v366_v38 = vsub.f32 %v256_v30, %v356_v37 }
 0x2ff   :  { %v370_v42 = vmul.f32 1.442695, %v366_v38 }
 0x300   :  { %v359_v39 = vpop.xlane.xlu1 %358  ;;  %v362_v44 = vpop.xlane.xlu0 %361 }
 0x301   :  { %v367_v40 = vsub.f32 %v776_v29, %v359_v39  ;;  %v368_v46 = vsub.f32 %v345_v33, %v362_v44 }
 0x303   :  { %v372_v41 = vmul.f32 1.442695, %v367_v40  ;;  %v374_v48 = vmul.f32 1.442695, %v368_v46 }
 0x304   :  { %v365_v43 = vpop.xlane.xlu1 %364  ;;  %v867_v0 = vpop.permute.xlu0 %866 }
 0x305   :  { %v369_v45 = vsub.f32 %v783_v32, %v365_v43  ;;  %870 = vpow2.f32 %v372_v41  ;;  %v869_v4 = vunpack.i.h.bf16 %v867_v0  ;;  %v868_v6 = vunpack.i.l.bf16 %v867_v0 }
 0x306   :  { %872 = vpow2.f32 %v370_v42 }
 0x307   :  { %v376_v47 = vmul.f32 1.442695, %v369_v45  ;;  %v832_v14 = vpack.c.bf16 %v869_v4, %v868_v6 }
 0x309   :  { %874 = vpow2.f32 %v376_v47 }
 0x30a   :  { %876 = vpow2.f32 %v374_v48 }
 0x30f   :  { %v871_v49 = vpop.eup %870 }
 0x310   :  { %v381_v50 = vsel %vm181_vm1, %v871_v49, 0.0  ;;  %v873_v51 = vpop.eup %872 }
 0x311   :  { %382 = vadd.xlane.f32.xlu1 %v381_v50  ;;  %v378_v52 = vsel %vm181_vm1, %v873_v51, 0.0 }
 0x313   :  { %v875_v53 = vpop.eup %874 }
 0x314   :  { %v387_v54 = vsel %vm181_vm1, %v875_v53, 0.0  ;;  %v877_v55 = vpop.eup %876 }
 0x315   :  { %379 = vadd.xlane.f32.xlu1 %v378_v52  ;;  %v384_v56 = vsel %vm181_vm1, %v877_v55, 0.0 }
 0x319   :  { %388 = vadd.xlane.f32.xlu1 %v387_v54 }
 0x31d   :  { %385 = vadd.xlane.f32.xlu1 %v384_v56 }
 0x32e   :  { %861 = vrot.lane.b32.xlu1 %v1090_v16, %s986_s2 }
 0x39e   :  { %v383_v60 = vpop.xlane.xlu1 %382 }
 0x3a2   :  { %v380_v61 = vpop.xlane.xlu1 %379 }
 0x3a3   :  { %878 = vrcp.f32 %v380_v61 }
 0x3a4   :  { %880 = vrcp.f32 %v383_v60 }
 0x3a6   :  { %v389_v62 = vpop.xlane.xlu1 %388 }
 0x3aa   :  { %v386_v63 = vpop.xlane.xlu1 %385 }
 0x3ab   :  { %882 = vrcp.f32 %v386_v63 }
 0x3ac   :  { %884 = vrcp.f32 %v389_v62 }
 0x3ad   :  { %v879_v1 = vpop.eup %878 }
 0x3ae   :  { %v862_v2 = vpop.permute.xlu1 %861  ;;  %v394_v3 = vmul.f32 %v879_v1, %v873_v51  ;;  %v881_v13 = vpop.eup %880 }
 0x3af   :  { %v864_v10 = vunpack.i.h.bf16 %v862_v2  ;;  %v863_v11 = vunpack.i.l.bf16 %v862_v2  ;;  %v395_v16 = vmul.f32 %v881_v13, %v871_v49 }
 0x3b0   :  { %788 = vmatprep.mubr.msk.f32.mxu1 %vm181_vm1, %v394_v3 }
 0x3b1   :  { %v828_v12 = vpack.c.bf16 %v864_v10, %v863_v11 }
 0x3b3   :  { %829 = vmatprep.subr.bf16.mxu1 %v828_v12 }
 0x3b4   :  { %831 = vmatpush3.bf16.msra.mxu1 %v828_v12 }
 0x3b5   :  { %v883_v15 = vpop.eup %882  ;;  %833 = vmatprep.subr.bf16.mxu1 %v832_v14 }
 0x3b6   :  { %v885_v17 = vpop.eup %884  ;;  %v396_v18 = vmul.f32 %v883_v15, %v877_v55 }
 0x3b7   :  { %789 = vmatmul.mubr.msk.f32.vlgmr.msra.gmra.mrb[2].mxu1 %vm181_vm1, %v395_v16  ;;  %v397_v19 = vmul.f32 %v885_v17, %v875_v53 }
 0x3b8   :  { %835 = vmatpush3.bf16.msra.mxu1 %v832_v14  ;;  %795 = vmatprep.mubr.msk.f32.mxu1 %vm181_vm1, %v396_v18 }
 0x3b9   :  { %840 = vmatprep.subr.bf16.mxu1 %v836_v59 }
 0x3bb   :  { %796 = vmatmul.mubr.msk.f32.vlgmr.msra.gmra.mrb[4].mxu1 %vm181_vm1, %v397_v19 }
 0x3bc   :  { %841 = vmatpush3.bf16.msra.mxu1 %v836_v59 }
 0x48a   :  { %v790_v20 = vpop.f32.mrb[2].mxu1 }
 0x48b   :  { %v476_v21 = vpop.f32.mrb[3].mxu1 }
 0x48c   :  { %802 = vmatprep.mubr.msk.f32.mxu0 %vm181_vm1, %v476_v21 }
 0x48d   :  { %803 = vmatmul.mubr.msk.f32.vlgmr.msra.gmra.mrb[6].mxu0 %vm181_vm1, %v790_v20 }
 0x48e   :  { %v797_v22 = vpop.f32.mrb[4].mxu1 }
 0x48f   :  { %v563_v23 = vpop.f32.mrb[5].mxu1 }
 0x490   :  { %805 = vmatprep.mubr.msk.f32.mxu1 %vm181_vm1, %v563_v23 }
 0x491   :  { %806 = vmatmul.mubr.msk.f32.vlgmr.msra.gmra.mrb[6].mxu1 %vm181_vm1, %v797_v22 }
 0x560   :  { %v804_v25 = vpop.f32.mrb[6].mxu0 }
 0x561   :  { %v665_v26 = vadd.f32 %v804_v25, %v721_v24  ;;  %v659_v27 = vpop.f32.mrb[7].mxu0 }
 0x562   :  { %v660_v28 = vadd.f32 %v721_v24, %v659_v27 }
 0x563   :  { %v679_v29 = vadd.f32 %v665_v26, %v1074_v7 }
 0x564   :  { %v678_v30 = vadd.f32 %v660_v28, %v1070_v5  ;;  %v807_v31 = vpop.f32.mrb[6].mxu1 }
 0x565   :  { %683 = vst.msk [vmem:[#allocation8 + $0x8] sm:$0xff] %vm77_vm0, %v679_v29  ;;  %v675_v32 = vadd.f32 %v807_v31, %v721_v24  ;;  %v669_v33 = vpop.f32.mrb[7].mxu1 }
 0x566   :  { %682 = vst.msk [vmem:[#allocation8] sm:$0xff] %vm77_vm0, %v678_v30  ;;  %v670_v34 = vadd.f32 %v721_v24, %v669_v33 }
 0x567   :  { %v681_v35 = vadd.f32 %v675_v32, %v1082_v9 }
 0x568   :  { %v680_v36 = vadd.f32 %v670_v34, %v1076_v8 }
 0x569   :  { %685 = vst.msk [vmem:[#allocation8 + $0x18] sm:$0xff] %vm77_vm0, %v681_v35 }
 0x56a   :  { %684 = vst.msk [vmem:[#allocation8 + $0x10] sm:$0xff] %vm77_vm0, %v680_v36 }
 0x56b   :  { %963 = shalt.err (!%p960_p0)
}
 0x56c   :  { %s964_s14 = scalar_lea.hbm %s1146_s5, 512 }
 0x56d   :  { %p965_p1 = scmp.ne.s32.totalorder %s1146_s5, %s964_s14  ;;  %p968_p2 = scmp.lt.u32.totalorder %s964_s14, %s1146_s5 }
 0x56f   :  { %p970_p3 = pnand %p968_p2, %p965_p1 }
 0x571   :  { %973 = shalt.err (!%p970_p3)
}
 0x572   :  { %697 = dma.vmem_to_hbm [thread:$0]  %s692_s11, 512, %s1146_s5, [#allocation4], %s982_s30, %s982_s30, %s983_s6  }
 0x573   :  { %978 = dma.done.wait [#allocation4], 512  }
 0x574   :  { %979 = vsyncadd [#allocation4], 4294966784 }
 0x575   :  { %701 = vsyncpa [#allocation3], 1 }
 0x576   :  { %702 = vsyncpa [#allocation6], 1 }
 0x577   :  { %703 = vsyncpa [#allocation4], 1 }

</bundles_post_ra>
